<compile_context>
chip_gen: v7x
topology: tpu7x:2x2x1
jax: 0.10.0
libtpu: 0.0.40
codegen_flags: <defaults>
</compile_context>

<pallas_src>
from dataclasses import dataclass
from typing import Optional

import jax
import jax.numpy as jnp
import numpy as np
from jax.experimental import pallas as pl
from jax.experimental.pallas import tpu as pltpu


@dataclass
class EncoderInput:
    """Data class for Encoder Input (mirrors the PyTorch dataclass)."""
    data_norm_type: str
    data: Optional[jnp.ndarray] = None  # NCHW image tensor


@dataclass
class EncoderOutput:
    """Data class for Encoder Output (mirrors the PyTorch dataclass)."""
    features: Optional[jnp.ndarray] = None


# -----------------------------------------------------------------------------
# Generation-aware tuning helpers
# -----------------------------------------------------------------------------

def _device_kind() -> str:
    try:
        return jax.devices()[0].device_kind.lower()
    except Exception:  # pragma: no cover - CPU/interpret fallback
        return ""


def _tile_bytes_for_device() -> int:
    """Per-generation row-slab size.

    v6e / v7x: 32 MiB default scoped VMEM -> 4 MiB tiles (live footprint with
    double-buffered aliased in/out ~= 16 MiB).  v5e (16 MiB scoped default) and
    unknown chips stay at 2 MiB tiles (~8 MiB live) so no vmem_limit_bytes
    override is ever required.
    """
    kind = _device_kind()
    if "v6" in kind or "v7" in kind:
        return 4 * 1024 * 1024
    return 2 * 1024 * 1024


def _sublane_multiple(dtype) -> int:
    """Sublane alignment for partial tiles, accounting for sub-32-bit packing."""
    itemsize = jnp.dtype(dtype).itemsize
    return {4: 8, 2: 16, 1: 32}.get(itemsize, 8)


def _dimension_semantics(num_steps: int):
    """CORE_PARALLEL on v7x (2 TCs shard disjoint row slabs); 'parallel' elsewhere."""
    if "v7" in _device_kind() and num_steps >= 2:
        return (pltpu.CORE_PARALLEL,)
    return ("parallel",)


def _choose_lane_width(total_elems: int) -> Optional[int]:
    """Largest lane-dense width (multiple of 128 lanes) dividing the element count."""
    for lane in (1024, 512, 256, 128):
        if total_elems % lane == 0:
            return lane
    return None


# -----------------------------------------------------------------------------
# Pallas identity / pass-through kernel (the base-class data path)
# -----------------------------------------------------------------------------

def _copy_kernel(x_ref, o_ref):
    # Identity body: load the VMEM tile and store it back (in-place via alias).
    o_ref[...] = x_ref[...]


def _pallas_passthrough(x: jnp.ndarray) -> jnp.ndarray:
    """Identity data path: lane-dense, row-tiled, output aliased onto the input."""
    total = x.size
    lane = _choose_lane_width(total)
    assert lane is not None, "caller guarantees lane divisibility"

    rows = total // lane
    x2d = x.reshape(rows, lane)

    itemsize = jnp.dtype(x2d.dtype).itemsize
    row_bytes = lane * itemsize
    tile_rows = max(1, _tile_bytes_for_device() // row_bytes)
    if tile_rows >= rows:
        # Full extent along rows: the (8,128) divisibility rule is waived when
        # the block equals the full array dims.
        tile_rows = rows
    else:
        # Dtype-aware sublane alignment for partial tiles (packed dtypes).
        sub = _sublane_multiple(x2d.dtype)
        tile_rows = max(sub, (tile_rows // sub) * sub)

    num_steps = pl.cdiv(rows, tile_rows)

    y2d = pl.pallas_call(
        _copy_kernel,
        out_shape=jax.ShapeDtypeStruct((rows, lane), x2d.dtype),
        grid=(num_steps,),
        in_specs=[pl.BlockSpec((tile_rows, lane), lambda i: (i, 0))],
        out_specs=pl.BlockSpec((tile_rows, lane), lambda i: (i, 0)),
        # Reuse the input HBM buffer as the output buffer (in-place identity).
        input_output_aliases={0: 0},
        # Pure memory op: tell XLA's scheduler exactly that.
        cost_estimate=pl.CostEstimate(
            flops=0,
            transcendentals=0,
            bytes_accessed=2 * rows * lane * itemsize,
        ),
        compiler_params=pltpu.CompilerParams(
            dimension_semantics=_dimension_semantics(num_steps),
        ),
    )(x2d)
    return y2d.reshape(x.shape)


# jit + donation so the input/output alias is realized by XLA without a
# copy-insertion: the caller's input buffer is consumed and becomes the output.
_passthrough_donated = jax.jit(_pallas_passthrough, donate_argnums=(0,))


def _identity_datapath(x: jnp.ndarray, *, force_pallas: bool = False) -> jnp.ndarray:
    """Identity data path with the review's fast-path bypasses.

    NOTE: when the Pallas path runs, the input buffer is donated (the output
    reuses it in place); callers must not reuse `x` on device afterwards.
    """
    lane = _choose_lane_width(x.size)
    if lane is None:
        # TODO(synk): element count not a multiple of 128 lanes; the base-class
        # body is the identity, so return the input directly (no compute).
        return x
    nbytes = x.size * jnp.dtype(x.dtype).itemsize
    if not force_pallas and nbytes <= _tile_bytes_for_device():
        # Aliased identity on a small input: metadata-only, skip the launch
        # (and the 2*N bytes of HBM traffic it would cost).
        return x
    return _passthrough_donated(x)


# -----------------------------------------------------------------------------
# Module port
# -----------------------------------------------------------------------------

class UniCeptionEncoderBase:
    """JAX/Pallas port of the UniCeption encoder base class (no parameters)."""

    def __init__(self, name: str, data_norm_type: str, size: Optional[str] = None):
        self.name: str = name
        self.size: Optional[str] = size
        self.data_norm_type: str = data_norm_type
        # No parameters to initialize: the PyTorch base class registers none.

    def _check_data_normalization_type(self, data_norm_type: str):
        assert data_norm_type == self.data_norm_type, (
            f"Input normalization type {data_norm_type} does not match the "
            f"encoder's normalization type {self.data_norm_type}."
        )

    def forward(self, encoder_input: EncoderInput, *, force_pallas: bool = False) -> EncoderOutput:
        # Base-class semantics: validate the normalization type; being abstract,
        # there is no further compute — the data path is the identity.
        # By default the identity is realized as a metadata-only pass-through;
        # the Pallas kernel is only launched for large inputs or when forced.
        self._check_data_normalization_type(encoder_input.data_norm_type)
        x = encoder_input.data
        if x is None:
            return EncoderOutput(features=None)
        y = _identity_datapath(x, force_pallas=force_pallas)
        return EncoderOutput(features=y)

    __call__ = forward


if __name__ == "__main__":
    key = jax.random.PRNGKey(0)
    # Small NCHW input consistent with an image encoder: batch=2, ch=4, 16x16.
    x = jax.random.normal(key, (2, 4, 16, 16), dtype=jnp.float32)
    # Host snapshot BEFORE the forced call: the device buffer is donated/reused.
    x_host = np.asarray(jax.device_get(x))

    encoder = UniCeptionEncoderBase(
        name="base_encoder", data_norm_type="identity", size=None
    )

    # 1) Default path: aliased identity on a tiny input → metadata-only bypass
    #    (no kernel launch, no HBM traffic) — the top-ranked review item.
    out_fast = encoder(EncoderInput(data_norm_type="identity", data=x))
    assert out_fast.features is x

    # 2) Forced Pallas path: exercise the kernel once on-TPU (donates x's buffer).
    out = encoder(
        EncoderInput(data_norm_type="identity", data=x), force_pallas=True
    )
    jax.block_until_ready(out.features)

    # Correctness: base-class data path is an exact passthrough.
    assert out.features.shape == x_host.shape
    assert out.features.dtype == x_host.dtype
    assert np.array_equal(np.asarray(jax.device_get(out.features)), x_host)

    print("KERNEL_OK")
</pallas_src>

<mosaic_0001>
module attributes {stable_mosaic.version = 11 : i64} {
  func.func @_copy_kernel(%arg0: i32, %arg1: memref<2x1024xf32, #tpu.memory_space<vmem>>, %arg2: memref<2x1024xf32, #tpu.memory_space<vmem>>) attributes {dimension_semantics = [#tpu.dimension_semantics<parallel>], iteration_bounds = array<i64: 1>, scalar_prefetch = 0 : i64, scratch_operands = 0 : i64, tpu.core_type = #tpu.core_type<tc>, window_params = [{transform_indices = @transform_0, window_bounds = array<i64: 2, 1024>}, {transform_indices = @transform_1, window_bounds = array<i64: 2, 1024>}]} {
    %c0 = arith.constant 0 : index
    %c0_0 = arith.constant 0 : index
    %0 = vector.load %arg1[%c0, %c0_0] : memref<2x1024xf32, #tpu.memory_space<vmem>>, vector<2x1024xf32>
    %c0_1 = arith.constant 0 : index
    %c0_2 = arith.constant 0 : index
    %1 = vector.load %arg2[%c0_1, %c0_2] : memref<2x1024xf32, #tpu.memory_space<vmem>>, vector<2x1024xf32>
    tpu.vector_store %arg2[%c0_1, %c0_2], %0 {strides = array<i32>} : memref<2x1024xf32, #tpu.memory_space<vmem>>, vector<2x1024xf32>,
    return
  }
  func.func @transform_0(%arg0: i32) -> (i32, i32) {
    %c0_i32 = arith.constant 0 : i32
    %c0_i32_0 = arith.constant 0 : i32
    return %arg0, %c0_i32 : i32, i32
  }
  func.func @transform_1(%arg0: i32) -> (i32, i32) {
    %c0_i32 = arith.constant 0 : i32
    %c0_i32_0 = arith.constant 0 : i32
    return %arg0, %c0_i32 : i32, i32
  }
}

</mosaic_0001>

<bundles_post_ra>
// kernel: _pallas_passthrough.1
= control target key start
LH: loop header
LB: loop body
LE: loop exit
PB: predicated region body
PF: predicated region fallthrough
CT: control target
= control target key end

     0   :  { %s38_s0 = inlined_call_operand.vmem [shape: f32[2,1024], index: 0, kind: input, shape index: {}, may-alias: {0,1}]   ;;  %s39_s1 = inlined_call_operand.vmem [shape: f32[2,1024], index: 1, kind: output, shape index: {}, may-alias: {0,1}]  }
   0x1   :  { %v8_v0 = vld [vmem:[%s38_s0] sm:$0xff]  ;;  %v9_v1 = vld [vmem:[%s38_s0 + $0x8] sm:$0xff] }
   0x2   :  { %10 = vst [vmem:[%s39_s1] sm:$0xff] %v8_v0  ;;  %11 = vst [vmem:[%s39_s1 + $0x8] sm:$0xff] %v9_v1 }

</bundles_post_ra>
